<compile_context>
chip_gen: v7x
topology: tpu7x:2x2x1
jax: 0.10.0
libtpu: 0.0.40
codegen_flags: <defaults>
</compile_context>

<pallas_src>
import jax
import jax.numpy as jnp
from jax.experimental import pallas as pl
from jax.experimental.pallas import tpu as pltpu


def _camera_rig_kernel(idx_ref,        # SMEM scalar prefetch: (B, 2) int32
                       rig_ref,        # VMEM: (1, 4, 4) f32  rig_t_world[frame]
                       cam_ref,        # VMEM: (1, 4, 4) f32  camera_t_rig[cam]
                       proj_ref,       # VMEM: (1, 1, P) f32  projection[cam]
                       pose_out_ref,   # VMEM: (1, 4, 4) f32
                       proj_out_ref):  # VMEM: (1, 1, P) f32
    del idx_ref  # the gather already happened in the index_maps
    a = cam_ref[0]    # (4, 4) camera_t_rig[cam]
    b = rig_ref[0]    # (4, 4) rig_t_world[frame]

    # camera_t_world = camera_t_rig @ rig_t_world, composed on the VPU as an
    # unrolled broadcast multiply-accumulate over k (no MXU, no 1-D extracts).
    acc = a[:, 0:1] * b[0:1, :]
    for k in range(1, 4):
        acc = acc + a[:, k:k + 1] * b[k:k + 1, :]
    pose_out_ref[0] = acc

    # Intrinsics row for the selected camera (already gathered by index_map).
    proj_out_ref[...] = proj_ref[...]


def camera_rig_lookup(image_idx, rig_t_world, camera_t_rig, projection):
    """Batched CameraRigTable lookup.

    Args:
      image_idx:    (B, 2) int32 rows of (frame_index, camera_index).
      rig_t_world:  (F, 4, 4) float32.
      camera_t_rig: (C, 4, 4) float32.
      projection:   (C, P) float32 intrinsics.

    Returns:
      poses:     (B, 4, 4) float32 camera_t_world = camera_t_rig @ rig_t_world.
      proj_rows: (B, P)   float32 gathered intrinsics rows.
    """
    F = rig_t_world.shape[0]
    C = camera_t_rig.shape[0]
    P = projection.shape[1]

    image_idx = jnp.asarray(image_idx, jnp.int32)
    B = image_idx.shape[0]

    # Dynamic indexing through index_maps has no runtime bounds check; clamp
    # on the host side so a bad index cannot read out-of-range memory.
    limits = jnp.array([F - 1, C - 1], jnp.int32)
    image_idx = jnp.clip(image_idx, 0, limits[None, :])

    # Keep the last two dims of every block equal to the full array dims so all
    # BlockSpecs satisfy the (8, 128) tiling rule trivially.
    proj3 = projection[:, None, :]                     # (C, 1, P)

    grid_spec = pltpu.PrefetchScalarGridSpec(
        num_scalar_prefetch=1,                         # image_idx lives in SMEM
        grid=(B,),
        in_specs=[
            # Gather-by-index_map: one tiny tile per input per lookup.
            pl.BlockSpec((1, 4, 4), lambda i, idx: (idx[i, 0], 0, 0)),  # rig
            pl.BlockSpec((1, 4, 4), lambda i, idx: (idx[i, 1], 0, 0)),  # cam
            pl.BlockSpec((1, 1, P), lambda i, idx: (idx[i, 1], 0, 0)),  # proj
        ],
        out_specs=(
            pl.BlockSpec((1, 4, 4), lambda i, idx: (i, 0, 0)),
            pl.BlockSpec((1, 1, P), lambda i, idx: (i, 0, 0)),
        ),
    )

    poses, proj_rows = pl.pallas_call(
        _camera_rig_kernel,
        out_shape=(
            jax.ShapeDtypeStruct((B, 4, 4), jnp.float32),
            jax.ShapeDtypeStruct((B, 1, P), jnp.float32),
        ),
        grid_spec=grid_spec,
        compiler_params=pltpu.CompilerParams(
            dimension_semantics=("arbitrary",)),
    )(image_idx, rig_t_world, camera_t_rig, proj3)

    return poses, proj_rows[:, 0, :]


def camera_rig_forward(image_idx, rig_t_world, camera_t_rig, projection):
    """Module-semantics forward: single image_idx of shape (2,).

    Matches CameraRigTable.forward: returns (pose (1, 4, 4), projection[cam] (P,)).
    """
    poses, proj_rows = camera_rig_lookup(
        image_idx[None, :], rig_t_world, camera_t_rig, projection)
    return poses, proj_rows[0]


def _reference_lookup(image_idx, rig_t_world, camera_t_rig, projection):
    frames = image_idx[:, 0]
    cams = image_idx[:, 1]
    poses = jnp.einsum('bij,bjk->bik',
                       camera_t_rig[cams], rig_t_world[frames])
    return poses, projection[cams]


if __name__ == "__main__":
    key = jax.random.PRNGKey(0)
    k1, k2, k3 = jax.random.split(key, 3)

    num_frames, num_cameras, P = 5, 3, 4

    # Deterministic "parameters": homogeneous transforms with [0,0,0,1] rows.
    def make_poses(k, n):
        top = jax.random.normal(k, (n, 3, 4), dtype=jnp.float32)
        bottom = jnp.tile(jnp.array([[[0.0, 0.0, 0.0, 1.0]]], jnp.float32),
                          (n, 1, 1))
        return jnp.concatenate([top, bottom], axis=1)

    rig_t_world = make_poses(k1, num_frames)                  # (F, 4, 4)
    camera_t_rig = make_poses(k2, num_cameras)                # (C, 4, 4)
    projection = jax.random.uniform(
        k3, (num_cameras, P), dtype=jnp.float32, minval=0.5, maxval=2.0)

    # Batched lookups (amortizes launch/DMA overhead over B lookups).
    image_idx_batch = jnp.array(
        [[0, 0], [2, 1], [4, 2], [1, 1], [3, 0], [2, 2]], dtype=jnp.int32)

    poses, proj_rows = jax.jit(camera_rig_lookup)(
        image_idx_batch, rig_t_world, camera_t_rig, projection)
    poses = jax.block_until_ready(poses)
    proj_rows = jax.block_until_ready(proj_rows)

    ref_poses, ref_proj = _reference_lookup(
        image_idx_batch, rig_t_world, camera_t_rig, projection)

    assert poses.shape == (6, 4, 4) and poses.dtype == jnp.float32
    assert proj_rows.shape == (6, P) and proj_rows.dtype == jnp.float32
    assert jnp.allclose(poses, ref_poses, atol=1e-5, rtol=1e-5)
    assert jnp.allclose(proj_rows, ref_proj, atol=1e-6, rtol=1e-6)

    # Single-lookup forward matching the PyTorch module semantics.
    image_idx = jnp.array([2, 1], dtype=jnp.int32)            # (frame, camera)
    pose, proj_row = jax.jit(camera_rig_forward)(
        image_idx, rig_t_world, camera_t_rig, projection)
    pose = jax.block_until_ready(pose)
    proj_row = jax.block_until_ready(proj_row)

    ref_pose = (camera_t_rig[1] @ rig_t_world[2])[None, :, :]
    assert pose.shape == (1, 4, 4)
    assert proj_row.shape == (P,)
    assert jnp.allclose(pose, ref_pose, atol=1e-5, rtol=1e-5)
    assert jnp.allclose(proj_row, projection[1], atol=1e-6, rtol=1e-6)

    print("KERNEL_OK")
</pallas_src>

<mosaic_0001>
module attributes {stable_mosaic.version = 11 : i64} {
  func.func @_camera_rig_kernel(%arg0: i32, %arg1: memref<6x2xi32, #tpu.memory_space<smem>>, %arg2: memref<1x4x4xf32, #tpu.memory_space<vmem>>, %arg3: memref<1x4x4xf32, #tpu.memory_space<vmem>>, %arg4: memref<1x1x4xf32, #tpu.memory_space<vmem>>, %arg5: memref<1x4x4xf32, #tpu.memory_space<vmem>>, %arg6: memref<1x1x4xf32, #tpu.memory_space<vmem>>) attributes {dimension_semantics = [#tpu.dimension_semantics<arbitrary>], iteration_bounds = array<i64: 6>, scalar_prefetch = 1 : i64, scratch_operands = 0 : i64, tpu.core_type = #tpu.core_type<tc>, window_params = [{transform_indices = @transform_0, window_bounds = array<i64: 1, 4, 4>}, {transform_indices = @transform_1, window_bounds = array<i64: 1, 4, 4>}, {transform_indices = @transform_2, window_bounds = array<i64: 1, 1, 4>}, {transform_indices = @transform_3, window_bounds = array<i64: 1, 4, 4>}, {transform_indices = @transform_4, window_bounds = array<i64: 1, 1, 4>}]} {
    %c0 = arith.constant 0 : index
    %c0_0 = arith.constant 0 : index
    %c0_1 = arith.constant 0 : index
    %0 = vector.load %arg3[%c0, %c0_0, %c0_1] : memref<1x4x4xf32, #tpu.memory_space<vmem>>, vector<1x4x4xf32>
    %1 = vector.shape_cast %0 : vector<1x4x4xf32> to vector<4x4xf32>
    %c0_2 = arith.constant 0 : index
    %c0_3 = arith.constant 0 : index
    %c0_4 = arith.constant 0 : index
    %2 = vector.load %arg2[%c0_2, %c0_3, %c0_4] : memref<1x4x4xf32, #tpu.memory_space<vmem>>, vector<1x4x4xf32>
    %3 = vector.shape_cast %2 : vector<1x4x4xf32> to vector<4x4xf32>
    %4 = vector.extract_strided_slice %1 {offsets = [0, 0], sizes = [4, 1], strides = [1, 1]} : vector<4x4xf32> to vector<4x1xf32>
    %5 = vector.extract_strided_slice %3 {offsets = [0, 0], sizes = [1, 4], strides = [1, 1]} : vector<4x4xf32> to vector<1x4xf32>
    %6 = vector.broadcast %4 : vector<4x1xf32> to vector<4x4xf32>
    %7 = vector.broadcast %5 : vector<1x4xf32> to vector<4x4xf32>
    %8 = arith.mulf %6, %7 : vector<4x4xf32>
    %9 = vector.extract_strided_slice %1 {offsets = [0, 1], sizes = [4, 1], strides = [1, 1]} : vector<4x4xf32> to vector<4x1xf32>
    %10 = vector.extract_strided_slice %3 {offsets = [1, 0], sizes = [1, 4], strides = [1, 1]} : vector<4x4xf32> to vector<1x4xf32>
    %11 = vector.broadcast %9 : vector<4x1xf32> to vector<4x4xf32>
    %12 = vector.broadcast %10 : vector<1x4xf32> to vector<4x4xf32>
    %13 = arith.mulf %11, %12 : vector<4x4xf32>
    %14 = arith.addf %8, %13 : vector<4x4xf32>
    %15 = vector.extract_strided_slice %1 {offsets = [0, 2], sizes = [4, 1], strides = [1, 1]} : vector<4x4xf32> to vector<4x1xf32>
    %16 = vector.extract_strided_slice %3 {offsets = [2, 0], sizes = [1, 4], strides = [1, 1]} : vector<4x4xf32> to vector<1x4xf32>
    %17 = vector.broadcast %15 : vector<4x1xf32> to vector<4x4xf32>
    %18 = vector.broadcast %16 : vector<1x4xf32> to vector<4x4xf32>
    %19 = arith.mulf %17, %18 : vector<4x4xf32>
    %20 = arith.addf %14, %19 : vector<4x4xf32>
    %21 = vector.extract_strided_slice %1 {offsets = [0, 3], sizes = [4, 1], strides = [1, 1]} : vector<4x4xf32> to vector<4x1xf32>
    %22 = vector.extract_strided_slice %3 {offsets = [3, 0], sizes = [1, 4], strides = [1, 1]} : vector<4x4xf32> to vector<1x4xf32>
    %23 = vector.broadcast %21 : vector<4x1xf32> to vector<4x4xf32>
    %24 = vector.broadcast %22 : vector<1x4xf32> to vector<4x4xf32>
    %25 = arith.mulf %23, %24 : vector<4x4xf32>
    %26 = arith.addf %20, %25 : vector<4x4xf32>
    %c0_5 = arith.constant 0 : index
    %c0_6 = arith.constant 0 : index
    %c0_7 = arith.constant 0 : index
    %27 = vector.load %arg5[%c0_5, %c0_6, %c0_7] : memref<1x4x4xf32, #tpu.memory_space<vmem>>, vector<1x4x4xf32>
    %28 = vector.shape_cast %27 : vector<1x4x4xf32> to vector<4x4xf32>
    %29 = vector.shape_cast %26 : vector<4x4xf32> to vector<1x4x4xf32>
    tpu.vector_store %arg5[%c0_5, %c0_6, %c0_7], %29 {strides = array<i32>} : memref<1x4x4xf32, #tpu.memory_space<vmem>>, vector<1x4x4xf32>,
    %c0_8 = arith.constant 0 : index
    %c0_9 = arith.constant 0 : index
    %c0_10 = arith.constant 0 : index
    %30 = vector.load %arg4[%c0_8, %c0_9, %c0_10] : memref<1x1x4xf32, #tpu.memory_space<vmem>>, vector<1x1x4xf32>
    %c0_11 = arith.constant 0 : index
    %c0_12 = arith.constant 0 : index
    %c0_13 = arith.constant 0 : index
    %31 = vector.load %arg6[%c0_11, %c0_12, %c0_13] : memref<1x1x4xf32, #tpu.memory_space<vmem>>, vector<1x1x4xf32>
    tpu.vector_store %arg6[%c0_11, %c0_12, %c0_13], %30 {strides = array<i32>} : memref<1x1x4xf32, #tpu.memory_space<vmem>>, vector<1x1x4xf32>,
    return
  }
  func.func @transform_0(%arg0: i32, %arg1: memref<6x2xi32, #tpu.memory_space<smem>>) -> (i32, i32, i32) {
    %0 = arith.index_cast %arg0 : i32 to index
    %c0 = arith.constant 0 : index
    %1 = memref.load %arg1[%0, %c0] : memref<6x2xi32, #tpu.memory_space<smem>>
    %c0_i32 = arith.constant 0 : i32
    %c0_i32_0 = arith.constant 0 : i32
    %c0_i32_1 = arith.constant 0 : i32
    return %1, %c0_i32, %c0_i32_0 : i32, i32, i32
  }
  func.func @transform_1(%arg0: i32, %arg1: memref<6x2xi32, #tpu.memory_space<smem>>) -> (i32, i32, i32) {
    %0 = arith.index_cast %arg0 : i32 to index
    %c1 = arith.constant 1 : index
    %1 = memref.load %arg1[%0, %c1] : memref<6x2xi32, #tpu.memory_space<smem>>
    %c0_i32 = arith.constant 0 : i32
    %c0_i32_0 = arith.constant 0 : i32
    %c0_i32_1 = arith.constant 0 : i32
    return %1, %c0_i32, %c0_i32_0 : i32, i32, i32
  }
  func.func @transform_2(%arg0: i32, %arg1: memref<6x2xi32, #tpu.memory_space<smem>>) -> (i32, i32, i32) {
    %0 = arith.index_cast %arg0 : i32 to index
    %c1 = arith.constant 1 : index
    %1 = memref.load %arg1[%0, %c1] : memref<6x2xi32, #tpu.memory_space<smem>>
    %c0_i32 = arith.constant 0 : i32
    %c0_i32_0 = arith.constant 0 : i32
    %c0_i32_1 = arith.constant 0 : i32
    return %1, %c0_i32, %c0_i32_0 : i32, i32, i32
  }
  func.func @transform_3(%arg0: i32, %arg1: memref<6x2xi32, #tpu.memory_space<smem>>) -> (i32, i32, i32) {
    %c0_i32 = arith.constant 0 : i32
    %c0_i32_0 = arith.constant 0 : i32
    %c0_i32_1 = arith.constant 0 : i32
    return %arg0, %c0_i32, %c0_i32_0 : i32, i32, i32
  }
  func.func @transform_4(%arg0: i32, %arg1: memref<6x2xi32, #tpu.memory_space<smem>>) -> (i32, i32, i32) {
    %c0_i32 = arith.constant 0 : i32
    %c0_i32_0 = arith.constant 0 : i32
    %c0_i32_1 = arith.constant 0 : i32
    return %arg0, %c0_i32, %c0_i32_0 : i32, i32, i32
  }
}

</mosaic_0001>

<bundles_post_ra>
// kernel: camera_rig_lookup.1
= control target key start
LH: loop header
LB: loop body
LE: loop exit
PB: predicated region body
PF: predicated region fallthrough
CT: control target
= control target key end

     0   :  { %s584_s0 = inlined_call_operand.vmem [shape: s32[6,2], index: 0, kind: input, shape index: {}]   ;;  %s585_s1 = inlined_call_operand.vmem [shape: f32[5,4,4], index: 1, kind: input, shape index: {}]   ;;  %s586_s2 = inlined_call_operand.vmem [shape: f32[3,4,4], index: 2, kind: input, shape index: {}]   ;;  %s587_s3 = inlined_call_operand.vmem [shape: f32[3,1,4], index: 3, kind: input, shape index: {}]   ;;  %s588_s4 = inlined_call_operand.vmem [shape: f32[6,4,4], index: 4, kind: output, shape index: {0}]   ;;  %s589_s5 = inlined_call_operand.vmem [shape: f32[6,1,4], index: 5, kind: output, shape index: {1}]  }
   0x1   :  { %s11_s20 = sshll.u32 %s584_s0, 4  ;;  %s12_s20 = int_to_ptr.vmem [resolvable:$true] %s11_s20 }
   0x2   :  { %s485_s21 = scalar_lea.vmem %s12_s20, 128  ;;  %p490_p1 = scmp.lt.s32.totalorder %s12_s20, %s12_s20 }
   0x3   :  { %p486_p0 = scmp.ne.s32.totalorder %s12_s20, %s485_s21  ;;  %p491_p2 = scmp.lt.s32.totalorder %s485_s21, %s485_s21 }
   0x5   :  { %p492_p3 = por %p491_p2, %p490_p1 }
   0x7   :  { %p493_p4 = pnand %p492_p3, %p486_p0 }
   0x9   :  { %496 = shalt.err (!%p493_p4)  }
   0xa   :  { %s507_s22 = smov [#allocation3]  }
   0xb   :  { %14 = dma.vmem_to_smem %s12_s20, 128, %s507_s22, [#allocation2] }
   0xc   :  { %501 = dma.done.wait [#allocation2], 128 }
   0xd   :  { %502 = vsyncadd [#allocation2], 4294967168 }
   0xe   :  { %16 = sfence }
   0xf   :  { %s545_s23 = smov 0  }
  0x10 LB: > { %s551_s0 = sadd.s32 4294967295, %s505_s23   ;;  %p452_p5 = scmp.ge.s32.totalorder %s505_s23, 1  ;;  %s505_s23 = sphi %s545_s23, %s22_s23  }
  0x11   : > { %p220_p6 = scmp.lt.s32.totalorder %s505_s23, 7 }
  0x13   : > { %p221_p7 = pnand %p452_p5, %p220_p6 }
  0x14   : > { %s453_s24 = sshll.u32 (!%p221_p7), %s551_s0, 7  ;;  %v508_v0 = vmov (!%p221_p7), 0   ;;  %v509_v1 = vmov (!%p221_p7), 2   ;;  %v510_v3 = vmov (!%p221_p7), 1   ;;  %v511_v4 = vmov (!%p221_p7), 3   ;;  %p289_p10 = scmp.lt.s32.totalorder (!%p221_p7), %s551_s0, 5 }
  0x15   : > { %224 = sbr.rel (%p221_p7) target bundleno = 176 (0xb0), region = 32  ;;  %480 = vset.pattern.permute.xlu0 (!%p221_p7), %v508_v0  ;;  %s271_s25 = sadd.s32 (!%p221_p7), 1, %s453_s24  ;;  %482 = vset.pattern.permute.xlu1 (!%p221_p7), %v509_v1  ;;  %vm341_vm0 = vcmask (!%p221_p7), 24576   ;;  %v303_v6 = vlaneseq (!%p221_p7)  ;;  %vm338_vm1 = vcmask (!%p221_p7), 27648  }
  0x16   : > { %s272_s26 = sld [smem:[#allocation3 + %s271_s25]] (!%p221_p7) }
  0x17   : > { %s282_s27 = sld [smem:[#allocation3 + %s271_s25]] (!%p221_p7)  ;;  %v304_v7 = vshrl.u32 (!%p221_p7), %v303_v6, 7 }
  0x18   : > { %s263_s14 = sld [smem:[#allocation3 + %s453_s24]] (!%p221_p7) }
  0x19   : > { %v305_v8 = vsub.s32 (!%p221_p7), 0, %v304_v7  ;;  %v314_v9 = vsub.s32 (!%p221_p7), 1, %v304_v7  ;;  %v324_v12 = vsub.s32 (!%p221_p7), 2, %v304_v7  ;;  %v334_v14 = vsub.s32 (!%p221_p7), 3, %v304_v7 }
  0x1c   : > { %p273_p8 = scmp.lt.s32.totalorder %s272_s26, 2 }
  0x1d   : > { %p283_p9 = scmp.lt.s32.totalorder %s282_s27, 2 }
  0x1e   : > { %s591_s26 = smov (!%p273_p8, %s272_s26), 2  ;;  %p264_p11 = scmp.lt.s32.totalorder %s263_s14, 4 }
  0x1f   : > { %s456_s28 = sshll.u32 %s591_s26, 2  ;;  %s593_s27 = smov (!%p283_p9, %s282_s27), 2 }
  0x20   : > { %s276_s6 = scalar_lea.vmem %s586_s2, %s456_s28  ;;  %s285_s9 = scalar_lea.vmem %s587_s3, %s593_s27 }
  0x21   : > { %v296_v2 = vld [vmem:[%s276_s6] sm:$0xf]  ;;  %s566_s10 = scalar_select %p289_p10, %s551_s0, 5 }
  0x22   : > { %300 = vperm.xlu0 %480, %v296_v2   ;;  %319 = vperm.xlu1 %482, %v296_v2   ;;  %v340_v5 = vld [vmem:[%s285_s9] sm:$0x1]  ;;  %s595_s14 = smov (!%p264_p11, %s263_s14), 4 }
  0x23   : > { %s295_s13 = scalar_lea.vmem %s589_s5, %s566_s10  ;;  %s454_s15 = sshll.u32 %s595_s14, 2 }
  0x24   : > { %342 = vst.msk [vmem:[%s295_s13] sm:$0x1] %vm341_vm0, %v340_v5  ;;  %s267_s18 = scalar_lea.vmem %s585_s1, %s454_s15  ;;  %s458_s19 = sshll.u32 %s566_s10, 2 }
  0x25   : > { %v297_v10 = vld [vmem:[%s267_s18] sm:$0xf]  ;;  %s292_s22 = scalar_lea.vmem %s588_s4, %s458_s19 }
  0x26   : > { %481 = vset.pattern.permute.xlu0 %v510_v3  ;;  %483 = vset.pattern.permute.xlu1 %v511_v4  ;;  %v306_v15 = vrot.slane %v297_v10, %v305_v8  ;;  %v315_v16 = vrot.slane %v297_v10, %v314_v9  ;;  %v325_v17 = vrot.slane %v297_v10, %v324_v12 }
  0x27   : > { %309 = vperm.xlu0 %481, %v296_v2   ;;  %329 = vperm.xlu1 %483, %v296_v2   ;;  %v335_v18 = vrot.slane %v297_v10, %v334_v14 }
  0x2b   : > { %484 = vset.pattern.permute.xlu0 %v511_v4 }
  0xa1   : > { %v301_v11 = vpop.permute.xlu0 %300  ;;  %v320_v13 = vpop.permute.xlu1 %319 }
  0xa2   : > { %v307_v21 = vmul.f32 %v306_v15, %v301_v11  ;;  %v326_v23 = vmul.f32 %v325_v17, %v320_v13 }
  0xa6   : > { %v310_v19 = vpop.permute.xlu0 %309  ;;  %v330_v20 = vpop.permute.xlu1 %329 }
  0xa7   : > { %v316_v22 = vmul.f32 %v315_v16, %v310_v19  ;;  %v336_v25 = vmul.f32 %v335_v18, %v330_v20 }
  0xa9   : > { %v317_v24 = vadd.f32 %v316_v22, %v307_v21 }
  0xab   : > { %v327_v26 = vadd.f32 %v326_v23, %v317_v24 }
  0xad   : > { %v337_v27 = vadd.f32 %v336_v25, %v327_v26 }
  0xaf   : > { %339 = vst.msk [vmem:[%s292_s22] sm:$0xf] %vm338_vm1, %v337_v27 }
  0xb0 PF: > { %s22_s23 = sadd.s32 1, %s505_s23  }
  0xb1   : > { %p19_p12 = scmp.ge.s32.totalorder %s22_s23, 8  }
  0xb3   :  { %21 = sbr.rel (!%p19_p12) target bundleno = 16 (0x10), region = 80 }

</bundles_post_ra>
